<compile_context>
chip_gen: v5e
topology: v5e:2x2
jax: 0.10.0
libtpu: 0.0.40
codegen_flags: <defaults>
</compile_context>

<pallas_src>
import math
import jax
import jax.numpy as jnp
from jax.experimental import pallas as pl
from jax.experimental.pallas import tpu as pltpu

# Logical (PyTorch) dims; hidden dims are zero-padded to 128 lanes.
D_IN, H1, H2, D_OUT = 387, 80, 40, 1
H1_P, H2_P = 128, 128

MAX_TM = 4096       # batch-tile cap; fits VMEM on v5e/v6e/v7x with 32 MiB scoped limit
SPLIT_BATCH = 256   # above this, force an even number (>=2) of grid steps (v7x 2-TC)


def _cdiv(a, b):
    return -(-a // b)


def _round_up(n, m):
    return ((n + m - 1) // m) * m


def _pad2(a, rows, cols):
    r, c = a.shape
    return jnp.pad(a, ((0, rows - r), (0, cols - c)))


def mlp_kernel(x_ref, w1_ref, b1_ref, w2_ref, b2_ref, w3_ref, b3_ref, o_ref):
    # Layer 1: Linear(387 -> 80, padded to 128) + tanh.
    # f32 accumulation; bias add and tanh stay f32 (v5e-safe on the bf16 path).
    x = x_ref[...].astype(w1_ref.dtype)  # no-op when dtypes already match
    h = jnp.dot(x, w1_ref[...], preferred_element_type=jnp.float32)
    h = jnp.tanh(h + b1_ref[...])
    # Layer 2: Linear(80 -> 40, padded 128 -> 128) + tanh
    h = jnp.dot(h.astype(w2_ref.dtype), w2_ref[...],
                preferred_element_type=jnp.float32)
    h = jnp.tanh(h + b2_ref[...])
    # Layer 3: Linear(40 -> 1, padded 128 -> 1), no activation (matches forward())
    out = jnp.dot(h.astype(w3_ref.dtype), w3_ref[...],
                  preferred_element_type=jnp.float32)
    o_ref[...] = (out + b3_ref[...]).astype(o_ref.dtype)


def prepare_params(params, dtype=jnp.float32):
    """Zero-pad hidden dims to 128 lanes once, outside the kernel.

    w1 keeps its 387 contraction rows (x is never feature-padded).  Zero
    padding is exact: padded hidden columns stay 0 through tanh and padded
    weight rows contribute 0.  Biases stay f32 so bias-add/tanh run in f32.
    """
    w1, b1, w2, b2, w3, b3 = params
    return (
        _pad2(w1, D_IN, H1_P).astype(dtype),
        _pad2(b1, 1, H1_P).astype(jnp.float32),
        _pad2(w2, H1_P, H2_P).astype(dtype),
        _pad2(b2, 1, H2_P).astype(jnp.float32),
        _pad2(w3, H2_P, D_OUT).astype(dtype),
        b3.astype(jnp.float32),
    )


def _choose_tiling(batch, max_tile):
    """Even batch split; >= 2 (even) grid steps for large batches (v7x 2 TCs)."""
    n_tiles = max(1, _cdiv(batch, max_tile))
    if batch > SPLIT_BATCH:
        n_tiles = max(2, n_tiles)
        n_tiles += n_tiles % 2
    tm = _round_up(_cdiv(batch, n_tiles), 8)
    return tm, n_tiles


def my_network_forward(x, padded_params, *, max_tile=MAX_TM):
    w1, b1, w2, b2, w3, b3 = padded_params
    batch = x.shape[0]
    if batch == 0:
        return jnp.zeros((0, D_OUT), jnp.float32)

    tm, n_tiles = _choose_tiling(batch, max_tile)
    batch_p = n_tiles * tm

    # Pad the batch dim only, and only when strictly needed.  The feature dim
    # stays 387 and there is no wrapper-side dtype cast: x is DMA'd exactly as
    # supplied and (if params are bf16) cast per-tile in VMEM inside the kernel.
    if batch_p != batch:
        x = jnp.pad(x, ((0, batch_p - batch), (0, 0)))

    flops = 2 * batch_p * (D_IN * H1_P + H1_P * H2_P + H2_P * D_OUT)
    transcendentals = batch_p * (H1_P + H2_P)
    bytes_accessed = (
        batch_p * D_IN * x.dtype.itemsize
        + batch_p * D_OUT * 4
        + sum(int(p.size) * p.dtype.itemsize for p in padded_params)
    )

    out = pl.pallas_call(
        mlp_kernel,
        out_shape=jax.ShapeDtypeStruct((batch_p, D_OUT), jnp.float32),
        grid=(n_tiles,),
        in_specs=[
            pl.BlockSpec((tm, D_IN), lambda i: (i, 0)),      # x: tiled over batch
            pl.BlockSpec((D_IN, H1_P), lambda i: (0, 0)),    # w1: VMEM-resident
            pl.BlockSpec((1, H1_P), lambda i: (0, 0)),       # b1
            pl.BlockSpec((H1_P, H2_P), lambda i: (0, 0)),    # w2
            pl.BlockSpec((1, H2_P), lambda i: (0, 0)),       # b2
            pl.BlockSpec((H2_P, D_OUT), lambda i: (0, 0)),   # w3
            pl.BlockSpec((1, D_OUT), lambda i: (0, 0)),      # b3
        ],
        out_specs=pl.BlockSpec((tm, D_OUT), lambda i: (i, 0)),
        compiler_params=pltpu.CompilerParams(
            dimension_semantics=("parallel",),
            vmem_limit_bytes=32 * 1024 * 1024,
        ),
        cost_estimate=pl.CostEstimate(
            flops=flops,
            transcendentals=transcendentals,
            bytes_accessed=bytes_accessed,
        ),
    )(x, w1, b1, w2, b2, w3, b3)

    return out[:batch]


def my_network_predict(x, padded_params):
    # MyNetwork.predict: sign-threshold tanh(forward(x)).  The original
    # per-row Python loop is host-side logic; done with jnp.where outside the
    # kernel (forward pass itself is the Pallas kernel above).
    out = my_network_forward(x, padded_params)
    return jnp.where(jnp.tanh(out[:, 0]) > 0, 1, -1).astype(jnp.int32)


def init_params(key):
    """PyTorch nn.Linear default init (U[-1/sqrt(fan_in), +1/sqrt(fan_in)])."""
    keys = jax.random.split(key, 6)

    def linear(kw, kb, fan_in, fan_out):
        bound = 1.0 / math.sqrt(fan_in)
        w = jax.random.uniform(kw, (fan_in, fan_out), jnp.float32, -bound, bound)
        b = jax.random.uniform(kb, (1, fan_out), jnp.float32, -bound, bound)
        return w, b

    w1, b1 = linear(keys[0], keys[1], D_IN, H1)
    w2, b2 = linear(keys[2], keys[3], H1, H2)
    w3, b3 = linear(keys[4], keys[5], H2, D_OUT)
    return (w1, b1, w2, b2, w3, b3)


def reference_forward(x, params):
    w1, b1, w2, b2, w3, b3 = params
    h = jnp.tanh(x @ w1 + b1)
    h = jnp.tanh(h @ w2 + b2)
    return h @ w3 + b3


if __name__ == "__main__":
    key = jax.random.PRNGKey(0)
    k_x, k_x2, k_x3, k_p = jax.random.split(key, 4)

    params = init_params(k_p)

    # --- f32 path: tight check against the pure-JAX reference ---
    padded_f32 = prepare_params(params, dtype=jnp.float32)

    batch = 8
    x = jax.random.normal(k_x, (batch, D_IN), dtype=jnp.float32)
    out = jax.block_until_ready(my_network_forward(x, padded_f32))
    ref = reference_forward(x, params)
    assert out.shape == (batch, D_OUT)
    assert jnp.allclose(out, ref, atol=1e-5, rtol=1e-5)

    # Multi-tile case: exercises the batch grid, resident weights and batch-only
    # padding (100 rows with tile 32 -> 4 grid steps, last one partially padded).
    batch2 = 100
    x2 = jax.random.normal(k_x2, (batch2, D_IN), dtype=jnp.float32)
    out2 = jax.block_until_ready(my_network_forward(x2, padded_f32, max_tile=32))
    ref2 = reference_forward(x2, params)
    assert out2.shape == (batch2, D_OUT)
    assert jnp.allclose(out2, ref2, atol=1e-5, rtol=1e-5)

    # --- bf16 path: halved HBM traffic; looser tolerance vs f32 reference ---
    padded_bf16 = prepare_params(params, dtype=jnp.bfloat16)
    batch3 = 300  # > SPLIT_BATCH -> 2 grid steps (keeps both v7x TensorCores busy)
    x3 = jax.random.normal(k_x3, (batch3, D_IN), dtype=jnp.float32)
    out3 = jax.block_until_ready(
        my_network_forward(x3.astype(jnp.bfloat16), padded_bf16))
    ref3 = reference_forward(x3, params)
    assert out3.shape == (batch3, D_OUT)
    assert jnp.allclose(out3, ref3, atol=1e-1, rtol=1e-1)
    assert bool(jnp.all(jnp.isfinite(out3)))

    # predict() path (sign threshold computed outside the kernel)
    pred = jax.block_until_ready(my_network_predict(x, padded_f32))
    assert pred.shape == (batch,)
    assert bool(jnp.all(jnp.abs(pred) == 1))

    print("KERNEL_OK")
</pallas_src>

<mosaic_0001>
module attributes {stable_mosaic.version = 11 : i64} {
  func.func @mlp_kernel(%arg0: i32, %arg1: memref<8x387xf32, #tpu.memory_space<vmem>>, %arg2: memref<387x128xf32, #tpu.memory_space<vmem>>, %arg3: memref<1x128xf32, #tpu.memory_space<vmem>>, %arg4: memref<128x128xf32, #tpu.memory_space<vmem>>, %arg5: memref<1x128xf32, #tpu.memory_space<vmem>>, %arg6: memref<128x1xf32, #tpu.memory_space<vmem>>, %arg7: memref<1x1xf32, #tpu.memory_space<vmem>>, %arg8: memref<8x1xf32, #tpu.memory_space<vmem>>) attributes {dimension_semantics = [#tpu.dimension_semantics<parallel>], iteration_bounds = array<i64: 1>, scalar_prefetch = 0 : i64, scratch_operands = 0 : i64, tpu.core_type = #tpu.core_type<tc>, window_params = [{transform_indices = @transform_0, window_bounds = array<i64: 8, 387>}, {pipeline_mode = #tpu.pipeline_mode<synchronous>, transform_indices = @transform_1, window_bounds = array<i64: 387, 128>}, {pipeline_mode = #tpu.pipeline_mode<synchronous>, transform_indices = @transform_2, window_bounds = array<i64: 1, 128>}, {pipeline_mode = #tpu.pipeline_mode<synchronous>, transform_indices = @transform_3, window_bounds = array<i64: 128, 128>}, {pipeline_mode = #tpu.pipeline_mode<synchronous>, transform_indices = @transform_4, window_bounds = array<i64: 1, 128>}, {pipeline_mode = #tpu.pipeline_mode<synchronous>, transform_indices = @transform_5, window_bounds = array<i64: 128, 1>}, {pipeline_mode = #tpu.pipeline_mode<synchronous>, transform_indices = @transform_6, window_bounds = array<i64: 1, 1>}, {transform_indices = @transform_7, window_bounds = array<i64: 8, 1>}]} {
    %c0 = arith.constant 0 : index
    %c0_0 = arith.constant 0 : index
    %0 = vector.load %arg1[%c0, %c0_0] : memref<8x387xf32, #tpu.memory_space<vmem>>, vector<8x387xf32>
    %c0_1 = arith.constant 0 : index
    %c0_2 = arith.constant 0 : index
    %1 = vector.load %arg2[%c0_1, %c0_2] : memref<387x128xf32, #tpu.memory_space<vmem>>, vector<387x128xf32>
    %cst = arith.constant dense<0.000000e+00> : vector<8x128xf32>
    %2 = tpu.matmul %0, %1, %cst {dimension_numbers = #tpu.dot_dimension_numbers<[1], [0], [0], [1], [0, 0, 1, 1], [], []>} : vector<8x387xf32>, vector<387x128xf32>, vector<8x128xf32> -> vector<8x128xf32>
    %c0_3 = arith.constant 0 : index
    %c0_4 = arith.constant 0 : index
    %3 = vector.load %arg3[%c0_3, %c0_4] : memref<1x128xf32, #tpu.memory_space<vmem>>, vector<1x128xf32>
    %4 = vector.broadcast %3 : vector<1x128xf32> to vector<8x128xf32>
    %5 = arith.addf %2, %4 : vector<8x128xf32>
    %6 = math.tanh %5 : vector<8x128xf32>
    %c0_5 = arith.constant 0 : index
    %c0_6 = arith.constant 0 : index
    %7 = vector.load %arg4[%c0_5, %c0_6] : memref<128x128xf32, #tpu.memory_space<vmem>>, vector<128x128xf32>
    %cst_7 = arith.constant dense<0.000000e+00> : vector<8x128xf32>
    %8 = tpu.matmul %6, %7, %cst_7 {dimension_numbers = #tpu.dot_dimension_numbers<[1], [0], [0], [1], [0, 0, 1, 1], [], []>} : vector<8x128xf32>, vector<128x128xf32>, vector<8x128xf32> -> vector<8x128xf32>
    %c0_8 = arith.constant 0 : index
    %c0_9 = arith.constant 0 : index
    %9 = vector.load %arg5[%c0_8, %c0_9] : memref<1x128xf32, #tpu.memory_space<vmem>>, vector<1x128xf32>
    %10 = vector.broadcast %9 : vector<1x128xf32> to vector<8x128xf32>
    %11 = arith.addf %8, %10 : vector<8x128xf32>
    %12 = math.tanh %11 : vector<8x128xf32>
    %c0_10 = arith.constant 0 : index
    %c0_11 = arith.constant 0 : index
    %13 = vector.load %arg6[%c0_10, %c0_11] : memref<128x1xf32, #tpu.memory_space<vmem>>, vector<128x1xf32>
    %cst_12 = arith.constant dense<0.000000e+00> : vector<8x1xf32>
    %14 = tpu.matmul %12, %13, %cst_12 {dimension_numbers = #tpu.dot_dimension_numbers<[1], [0], [0], [1], [0, 0, 1, 1], [], []>} : vector<8x128xf32>, vector<128x1xf32>, vector<8x1xf32> -> vector<8x1xf32>
    %c0_13 = arith.constant 0 : index
    %c0_14 = arith.constant 0 : index
    %15 = vector.load %arg7[%c0_13, %c0_14] : memref<1x1xf32, #tpu.memory_space<vmem>>, vector<1x1xf32>
    %16 = vector.broadcast %15 : vector<1x1xf32> to vector<8x1xf32>
    %17 = arith.addf %14, %16 : vector<8x1xf32>
    %c0_15 = arith.constant 0 : index
    %c0_16 = arith.constant 0 : index
    %18 = vector.load %arg8[%c0_15, %c0_16] : memref<8x1xf32, #tpu.memory_space<vmem>>, vector<8x1xf32>
    tpu.vector_store %arg8[%c0_15, %c0_16], %17 {strides = array<i32>} : memref<8x1xf32, #tpu.memory_space<vmem>>, vector<8x1xf32>,
    return
  }
  func.func @transform_0(%arg0: i32) -> (i32, i32) {
    %c0_i32 = arith.constant 0 : i32
    %c0_i32_0 = arith.constant 0 : i32
    return %arg0, %c0_i32 : i32, i32
  }
  func.func @transform_1(%arg0: i32) -> (i32, i32) {
    %c0_i32 = arith.constant 0 : i32
    %c0_i32_0 = arith.constant 0 : i32
    %c0_i32_1 = arith.constant 0 : i32
    return %c0_i32, %c0_i32_0 : i32, i32
  }
  func.func @transform_2(%arg0: i32) -> (i32, i32) {
    %c0_i32 = arith.constant 0 : i32
    %c0_i32_0 = arith.constant 0 : i32
    %c0_i32_1 = arith.constant 0 : i32
    return %c0_i32, %c0_i32_0 : i32, i32
  }
  func.func @transform_3(%arg0: i32) -> (i32, i32) {
    %c0_i32 = arith.constant 0 : i32
    %c0_i32_0 = arith.constant 0 : i32
    %c0_i32_1 = arith.constant 0 : i32
    return %c0_i32, %c0_i32_0 : i32, i32
  }
  func.func @transform_4(%arg0: i32) -> (i32, i32) {
    %c0_i32 = arith.constant 0 : i32
    %c0_i32_0 = arith.constant 0 : i32
    %c0_i32_1 = arith.constant 0 : i32
    return %c0_i32, %c0_i32_0 : i32, i32
  }
  func.func @transform_5(%arg0: i32) -> (i32, i32) {
    %c0_i32 = arith.constant 0 : i32
    %c0_i32_0 = arith.constant 0 : i32
    %c0_i32_1 = arith.constant 0 : i32
    return %c0_i32, %c0_i32_0 : i32, i32
  }
  func.func @transform_6(%arg0: i32) -> (i32, i32) {
    %c0_i32 = arith.constant 0 : i32
    %c0_i32_0 = arith.constant 0 : i32
    %c0_i32_1 = arith.constant 0 : i32
    return %c0_i32, %c0_i32_0 : i32, i32
  }
  func.func @transform_7(%arg0: i32) -> (i32, i32) {
    %c0_i32 = arith.constant 0 : i32
    %c0_i32_0 = arith.constant 0 : i32
    return %arg0, %c0_i32 : i32, i32
  }
}

</mosaic_0001>

<bundles_post_ra>
// kernel: tpu_custom_call.1
= control target key start
LH: loop header
LB: loop body
LE: loop exit
PB: predicated region body
PF: predicated region fallthrough
CT: control target
= control target key end

     0   :  { %s516_s0 = inlined_call_operand.hbm [shape: f32[8,387], index: 0, kind: input, shape index: {}]   ;;  %s517_s1 = inlined_call_operand.hbm [shape: f32[387,128], index: 1, kind: input, shape index: {}]   ;;  %s518_s2 = inlined_call_operand.vmem [shape: f32[1,128], index: 2, kind: input, shape index: {}]   ;;  %s519_s3 = inlined_call_operand.vmem [shape: f32[128,128], index: 3, kind: input, shape index: {}]   ;;  %s520_s4 = inlined_call_operand.vmem [shape: f32[1,128], index: 4, kind: input, shape index: {}]   ;;  %s521_s5 = inlined_call_operand.vmem [shape: f32[128,1], index: 5, kind: input, shape index: {}]   ;;  %s522_s6 = inlined_call_operand.<no memory space> [shape: f32[1,1], index: 6, kind: input, shape index: {}]   ;;  %s523_s7 = inlined_call_operand.vmem [shape: f32[8,1], index: 7, kind: output, shape index: {}]  }
   0x1   :  { %v12_v0 = vstv %s522_s6 }
   0x2   :  { %13 = vst [vmem:[#allocation2] sm:$0x1] %v12_v0 }
   0x3   :  { %14 = vsyncpa [#allocation4], 0  ;;  %s21_s28 = sshll.u32 %s516_s0, 4  ;;  %s22_s28 = int_to_ptr.hbm [resolvable:$true] %s21_s28 }
   0x4   :  { %15 = vsyncpa [#allocation6], 0  ;;  %s358_s29 = smov [#allocation3]   ;;  %s31_s10 = sshll.u32 %s517_s1, 4  ;;  %s32_s10 = int_to_ptr.hbm [resolvable:$true] %s31_s10 }
   0x5   :  { %s23_s30 = sshll.u32 %s358_s29, 4  ;;  %s359_s11 = smov [#allocation5]   ;;  %s24_s30 = int_to_ptr.vmem [resolvable:$true] %s23_s30 }
   0x6   :  { %26 = dma.hbm_to_vmem [thread:$0]  %s22_s28, 512, %s24_s30, [#allocation4]  }
   0x7   :  { %s33_s12 = sshll.u32 %s359_s11, 4  ;;  %s360_s6 = smov 128   ;;  %s34_s12 = int_to_ptr.vmem [resolvable:$true] %s33_s12 }
   0x8   :  { %s361_s13 = smov 8  }
   0x9   :  { %39 = dma.hbm_to_vmem [thread:$0]  %s32_s10, 6272, %s34_s12, [#allocation6], %s360_s6, %s360_s6, %s361_s13  }
   0xa   :  { %354 = dma.done.wait [#allocation4], 512  }
   0xb   :  { %355 = vsyncadd [#allocation4], 4294966784 }
   0xc   :  { %356 = dma.done.wait [#allocation6], 6272  }
   0xd   :  { %357 = vsyncadd [#allocation6], 4294961024  ;;  %v109_v1 = vld [vmem:[#allocation5 + $0x178] sm:$0xff]  ;;  %v108_v3 = vld [vmem:[#allocation5 + $0x170] sm:$0xff]  ;;  %vm119_vm0 = vcmask 1042432   ;;  %vm115_vm1 = vcmask 23552  }
   0xe   :  { %v77_v2 = vld [vmem:[#allocation5 + $0x78] sm:$0xff]  ;;  %163 = vmatpush.msra.mxu2 %v109_v1  ;;  %v76_v4 = vld [vmem:[#allocation5 + $0x70] sm:$0xff]  ;;  %v107_v6 = vld [vmem:[#allocation5 + $0x168] sm:$0xff]  ;;  %vm285_vm2 = vcmask 7168  }
   0xf   :  { %123 = vmatpush.msra.mxu0 %v77_v2  ;;  %v93_v5 = vld [vmem:[#allocation5 + $0xf8] sm:$0xff]  ;;  %v75_v7 = vld [vmem:[#allocation5 + $0x68] sm:$0xff]  ;;  %v92_v8 = vld [vmem:[#allocation5 + $0xf0] sm:$0xff] }
  0x10   :  { %143 = vmatpush.msra.mxu1 %v93_v5  ;;  %164 = vmatpush.msra.mxu2 %v108_v3  ;;  %v91_v9 = vld [vmem:[#allocation5 + $0xe8] sm:$0xff]  ;;  %v106_v10 = vld [vmem:[#allocation5 + $0x160] sm:$0xff]  ;;  %v105_v13 = vld [vmem:[#allocation5 + $0x158] sm:$0xff] }
  0x11   :  { %124 = vmatpush.msra.mxu0 %v76_v4  ;;  %v74_v11 = vld [vmem:[#allocation5 + $0x60] sm:$0xff]  ;;  %v73_v14 = vld [vmem:[#allocation5 + $0x58] sm:$0xff]  ;;  %v104_v16 = vld [vmem:[#allocation5 + $0x150] sm:$0xff] }
  0x12   :  { %144 = vmatpush.msra.mxu1 %v92_v8  ;;  %165 = vmatpush.msra.mxu2 %v107_v6  ;;  %v90_v12 = vld [vmem:[#allocation5 + $0xe0] sm:$0xff]  ;;  %v89_v15 = vld [vmem:[#allocation5 + $0xd8] sm:$0xff]  ;;  %v72_v17 = vld [vmem:[#allocation5 + $0x50] sm:$0xff] }
  0x13   :  { %125 = vmatpush.msra.mxu0 %v75_v7  ;;  %v88_v18 = vld [vmem:[#allocation5 + $0xd0] sm:$0xff]  ;;  %v103_v19 = vld [vmem:[#allocation5 + $0x148] sm:$0xff]  ;;  %v102_v22 = vld [vmem:[#allocation5 + $0x140] sm:$0xff] }
  0x14   :  { %145 = vmatpush.msra.mxu1 %v91_v9  ;;  %166 = vmatpush.msra.mxu2 %v106_v10  ;;  %v71_v20 = vld [vmem:[#allocation5 + $0x48] sm:$0xff]  ;;  %v70_v23 = vld [vmem:[#allocation5 + $0x40] sm:$0xff]  ;;  %v101_v25 = vld [vmem:[#allocation5 + $0x138] sm:$0xff] }
  0x15   :  { %126 = vmatpush.msra.mxu0 %v74_v11  ;;  %v87_v21 = vld [vmem:[#allocation5 + $0xc8] sm:$0xff]  ;;  %v86_v24 = vld [vmem:[#allocation5 + $0xc0] sm:$0xff]  ;;  %v69_v26 = vld [vmem:[#allocation5 + $0x38] sm:$0xff] }
  0x16   :  { %146 = vmatpush.msra.mxu1 %v90_v12  ;;  %167 = vmatpush.msra.mxu2 %v105_v13  ;;  %v85_v27 = vld [vmem:[#allocation5 + $0xb8] sm:$0xff]  ;;  %v100_v28 = vld [vmem:[#allocation5 + $0x130] sm:$0xff]  ;;  %v110_v30 = vld [vmem:[#allocation5 + $0x180] sm:$0x7] }
  0x17   :  { %127 = vmatpush.msra.mxu0 %v73_v14  ;;  %v68_v29 = vld [vmem:[#allocation5 + $0x30] sm:$0xff]  ;;  %v61_v32 = vld [vmem:[#allocation3 + $0x18] sm:$0xff]  ;;  %v99_v33 = vld [vmem:[#allocation5 + $0x128] sm:$0xff]  ;;  %293 = vmatpush.msk.msra.mxu3 %vm119_vm0, %v110_v30 }
  0x18   :  { %147 = vmatpush.msra.mxu1 %v89_v15  ;;  %168 = vmatpush.msra.mxu2 %v104_v16  ;;  %v84_v31 = vld [vmem:[#allocation5 + $0xb0] sm:$0xff]  ;;  %v67_v34 = vld [vmem:[#allocation5 + $0x28] sm:$0xff]  ;;  %v98_v35 = vld [vmem:[#allocation5 + $0x120] sm:$0xff] }
  0x19   :  { %128 = vmatpush.msra.mxu0 %v72_v17  ;;  %v83_v36 = vld [vmem:[#allocation5 + $0xa8] sm:$0xff]  ;;  %v219_v37 = vld [vmem:[%s519_s3 + $0x78] sm:$0xff]  ;;  %v66_v38 = vld [vmem:[#allocation5 + $0x20] sm:$0xff]  ;;  %294 = vmatmul.msk.f32.vlgmr.msra.gmra.mxu3 %vm115_vm1, %v61_v32 }
  0x1a   :  { %148 = vmatpush.msra.mxu1 %v88_v18  ;;  %169 = vmatpush.msra.mxu2 %v103_v19  ;;  %v82_v39 = vld [vmem:[#allocation5 + $0xa0] sm:$0xff]  ;;  %v218_v40 = vld [vmem:[%s519_s3 + $0x70] sm:$0xff]  ;;  %v97_v41 = vld [vmem:[#allocation5 + $0x118] sm:$0xff] }
  0x1b   :  { %129 = vmatpush.msra.mxu0 %v71_v20  ;;  %v65_v42 = vld [vmem:[#allocation5 + $0x18] sm:$0xff]  ;;  %224 = vmatpush.msrb.mxu3 %v219_v37  ;;  %v217_v44 = vld [vmem:[%s519_s3 + $0x68] sm:$0xff]  ;;  %v96_v45 = vld [vmem:[#allocation5 + $0x110] sm:$0xff] }
  0x1c   :  { %149 = vmatpush.msra.mxu1 %v87_v21  ;;  %170 = vmatpush.msra.mxu2 %v102_v22  ;;  %v81_v43 = vld [vmem:[#allocation5 + $0x98] sm:$0xff]  ;;  %v64_v46 = vld [vmem:[#allocation5 + $0x10] sm:$0xff]  ;;  %v95_v49 = vld [vmem:[#allocation5 + $0x108] sm:$0xff] }
  0x1d   :  { %130 = vmatpush.msra.mxu0 %v70_v23  ;;  %225 = vmatpush.msrb.mxu3 %v218_v40  ;;  %v80_v47 = vld [vmem:[#allocation5 + $0x90] sm:$0xff]  ;;  %v216_v48 = vld [vmem:[%s519_s3 + $0x60] sm:$0xff]  ;;  %v63_v50 = vld [vmem:[#allocation5 + $0x8] sm:$0xff] }
  0x1e   :  { %150 = vmatpush.msra.mxu1 %v86_v24  ;;  %171 = vmatpush.msra.mxu2 %v101_v25  ;;  %v79_v51 = vld [vmem:[#allocation5 + $0x88] sm:$0xff]  ;;  %v215_v52 = vld [vmem:[%s519_s3 + $0x58] sm:$0xff]  ;;  %v94_v53 = vld [vmem:[#allocation5 + $0x100] sm:$0xff] }
  0x1f   :  { %131 = vmatpush.msra.mxu0 %v69_v26  ;;  %226 = vmatpush.msrb.mxu3 %v217_v44  ;;  %v62_v54 = vld [vmem:[#allocation5] sm:$0xff]  ;;  %v60_v55 = vld [vmem:[#allocation3 + $0x10] sm:$0xff]  ;;  %v59_v59 = vld [vmem:[#allocation3 + $0x8] sm:$0xff] }
  0x20   :  { %151 = vmatpush.msra.mxu1 %v85_v27  ;;  %172 = vmatpush.msra.mxu2 %v100_v28  ;;  %v58_v56 = vld [vmem:[#allocation3] sm:$0xff]  ;;  %v214_v58 = vld [vmem:[%s519_s3 + $0x50] sm:$0xff]  ;;  %v211_v62 = vld [vmem:[%s519_s3 + $0x38] sm:$0xff] }
  0x21   :  { %132 = vmatpush.msra.mxu0 %v68_v29  ;;  %227 = vmatpush.msrb.mxu3 %v216_v48  ;;  %v78_v57 = vld [vmem:[#allocation5 + $0x80] sm:$0xff]  ;;  %v210_v63 = vld [vmem:[%s519_s3 + $0x30] sm:$0xff]  ;;  %v207_v2 = vld [vmem:[%s519_s3 + $0x18] sm:$0xff] }
  0x22   :  { %152 = vmatpush.msra.mxu1 %v84_v31  ;;  %173 = vmatpush.msra.mxu2 %v99_v33  ;;  %v213_v60 = vld [vmem:[%s519_s3 + $0x48] sm:$0xff]  ;;  %v212_v61 = vld [vmem:[%s519_s3 + $0x40] sm:$0xff]  ;;  %v206_v3 = vld [vmem:[%s519_s3 + $0x10] sm:$0xff] }
  0x23   :  { %133 = vmatpush.msra.mxu0 %v67_v34  ;;  %228 = vmatpush.msrb.mxu3 %v215_v52  ;;  %v209_v0 = vld [vmem:[%s519_s3 + $0x28] sm:$0xff]  ;;  %v208_v1 = vld [vmem:[%s519_s3 + $0x20] sm:$0xff]  ;;  %v260_v6 = vld [vmem:[%s521_s5 + $0x78] sm:$0xff] }
  0x24   :  { %153 = vmatpush.msra.mxu1 %v83_v36  ;;  %174 = vmatpush.msra.mxu2 %v98_v35  ;;  %v205_v4 = vld [vmem:[%s519_s3 + $0x8] sm:$0xff]  ;;  %v204_v5 = vld [vmem:[%s519_s3] sm:$0xff]  ;;  %v259_v7 = vld [vmem:[%s521_s5 + $0x70] sm:$0xff] }
  0x25   :  { %134 = vmatpush.msra.mxu0 %v66_v38  ;;  %229 = vmatpush.msrb.mxu3 %v214_v58  ;;  %v258_v8 = vld [vmem:[%s521_s5 + $0x68] sm:$0xff]  ;;  %v257_v9 = vld [vmem:[%s521_s5 + $0x60] sm:$0xff]  ;;  %v256_v10 = vld [vmem:[%s521_s5 + $0x58] sm:$0xff] }
  0x26   :  { %154 = vmatpush.msra.mxu1 %v82_v39  ;;  %175 = vmatpush.msra.mxu2 %v97_v41  ;;  %v255_v11 = vld [vmem:[%s521_s5 + $0x50] sm:$0xff]  ;;  %v254_v12 = vld [vmem:[%s521_s5 + $0x48] sm:$0xff]  ;;  %v299_v13 = vld [vmem:[%s518_s2] ss:$0 sm:$0xff] }
  0x27   :  { %135 = vmatpush.msra.mxu0 %v65_v42  ;;  %230 = vmatpush.msrb.mxu3 %v213_v60  ;;  %v253_v14 = vld [vmem:[%s521_s5 + $0x40] sm:$0xff]  ;;  %v252_v16 = vld [vmem:[%s521_s5 + $0x38] sm:$0xff]  ;;  %v251_v19 = vld [vmem:[%s521_s5 + $0x30] sm:$0xff] }
  0x28   :  { %155 = vmatpush.msra.mxu1 %v81_v43  ;;  %176 = vmatpush.msra.mxu2 %v96_v45  ;;  %v250_v21 = vld [vmem:[%s521_s5 + $0x28] sm:$0xff]  ;;  %v249_v27 = vld [vmem:[%s521_s5 + $0x20] sm:$0xff]  ;;  %v248_v28 = vld [vmem:[%s521_s5 + $0x18] sm:$0xff] }
  0x29   :  { %136 = vmatpush.msra.mxu0 %v64_v46  ;;  %231 = vmatpush.msrb.mxu3 %v212_v61  ;;  %v247_v29 = vld [vmem:[%s521_s5 + $0x10] sm:$0xff]  ;;  %v246_v30 = vld [vmem:[%s521_s5 + $0x8] sm:$0xff]  ;;  %v245_v31 = vld [vmem:[%s521_s5] sm:$0xff] }
  0x2a   :  { %156 = vmatpush.msra.mxu1 %v80_v47  ;;  %177 = vmatpush.msra.mxu2 %v95_v49  ;;  %v300_v32 = vld [vmem:[%s520_s4] ss:$0 sm:$0xff] }
  0x2b   :  { %137 = vmatpush.msra.mxu0 %v63_v50  ;;  %232 = vmatpush.msrb.mxu3 %v211_v62  ;;  %v301_v36 = vld [vmem:[#allocation2] ss:$0 sm:$0xff] }
  0x2c   :  { %157 = vmatpush.msra.mxu1 %v79_v51  ;;  %178 = vmatpush.msra.mxu2 %v94_v53 }
  0x2d   :  { %138 = vmatpush.msra.mxu0 %v62_v54  ;;  %179 = vmatmul.f32.vlgmr.msra.gmra.mxu2 %v60_v55 }
  0x2e   :  { %139 = vmatmul.f32.vlgmr.msra.gmra.mxu0 %v58_v56  ;;  %158 = vmatpush.msra.mxu1 %v78_v57 }
  0x2f   :  { %159 = vmatmul.f32.vlgmr.msra.gmra.mxu1 %v59_v59  ;;  %233 = vmatpush.msrb.mxu3 %v210_v63 }
  0x30   :  { %265 = vmatpush.msrb.mxu0 %v260_v6 }
  0x31   :  { %234 = vmatpush.msrb.mxu3 %v209_v0 }
  0x32   :  { %266 = vmatpush.msrb.mxu0 %v259_v7 }
  0x33   :  { %235 = vmatpush.msrb.mxu3 %v208_v1 }
  0x34   :  { %267 = vmatpush.msrb.mxu0 %v258_v8 }
  0x35   :  { %236 = vmatpush.msrb.mxu3 %v207_v2 }
  0x36   :  { %268 = vmatpush.msrb.mxu0 %v257_v9 }
  0x37   :  { %237 = vmatpush.msrb.mxu3 %v206_v3 }
  0x38   :  { %269 = vmatpush.msrb.mxu0 %v256_v10 }
  0x39   :  { %238 = vmatpush.msrb.mxu3 %v205_v4 }
  0x3a   :  { %270 = vmatpush.msrb.mxu0 %v255_v11 }
  0x3b   :  { %239 = vmatpush.msrb.mxu3 %v204_v5 }
  0x3c   :  { %271 = vmatpush.msrb.mxu0 %v254_v12 }
  0x3e   :  { %272 = vmatpush.msrb.mxu0 %v253_v14 }
  0x40   :  { %273 = vmatpush.msrb.mxu0 %v252_v16 }
  0x42   :  { %274 = vmatpush.msrb.mxu0 %v251_v19 }
  0x44   :  { %275 = vmatpush.msrb.mxu0 %v250_v21 }
  0x46   :  { %276 = vmatpush.msrb.mxu0 %v249_v27 }
  0x48   :  { %277 = vmatpush.msrb.mxu0 %v248_v28 }
  0x4a   :  { %278 = vmatpush.msrb.mxu0 %v247_v29 }
  0x4c   :  { %279 = vmatpush.msrb.mxu0 %v246_v30 }
  0x4e   :  { %280 = vmatpush.msrb.mxu0 %v245_v31 }
  0x9c   :  { %v200_v23 = vpop.f32.mrf.mxu3 }
  0xab   :  { %v140_v15 = vpop.f32.mrf.mxu0 }
  0xac   :  { %v141_v17 = vadd.f32 %v299_v13, %v140_v15  ;;  %v160_v18 = vpop.f32.mrf.mxu1 }
  0xae   :  { %v161_v20 = vadd.f32 %v160_v18, %v141_v17 }
  0xb0   :  { %v180_v22 = vpop.f32.mrf.mxu2 }
  0xb1   :  { %v181_v24 = vadd.f32 %v180_v22, %v161_v20 }
  0xb3   :  { %v201_v25 = vadd.f32 %v200_v23, %v181_v24 }
  0xb5   :  { %302 = vtanh.f32 %v201_v25 }
  0xbb   :  { %v303_v26 = vpop.eup %302 }
  0xbc   :  { %240 = vmatmul.f32.vlgmr.msrb.gmra.mxu3 %v303_v26 }
 0x13f   :  { %v241_v33 = vpop.f32.mrf.mxu3 }
 0x140   :  { %v242_v34 = vadd.f32 %v300_v32, %v241_v33 }
 0x142   :  { %304 = vtanh.f32 %v242_v34 }
 0x148   :  { %v305_v35 = vpop.eup %304 }
 0x149   :  { %281 = vmatmul.f32.vlgmr.msrb.gmra.mxu0 %v305_v35 }
 0x1c6   :  { %v282_v37 = vpop.f32.mrf.mxu0 }
 0x1c7   :  { %v283_v38 = vadd.f32 %v301_v36, %v282_v37 }
 0x1c9   :  { %286 = vst.msk [vmem:[%s523_s7] sm:$0xff] %vm285_vm2, %v283_v38 }
 0x1ca   :  { %291 = vsyncpa [#allocation4], 1 }
 0x1cb   :  { %292 = vsyncpa [#allocation6], 1 }

</bundles_post_ra>
